<compile_context>
chip_gen: v7x
topology: tpu7x:2x2x1
jax: 0.10.0
libtpu: 0.0.40
codegen_flags: <defaults>
</compile_context>

<pallas_src>
import numpy as np
import jax
import jax.numpy as jnp
from jax import lax
from jax.experimental import pallas as pl
from jax.experimental.pallas import tpu as pltpu


def _make_kernel(BB, H, WC, WCO):
    BBH = BB * H

    def kernel(x_ref, m_ref, b_ref, o_ref):
        # x_ref: (1, BB*H+2, W*C)   bf16, BB images stacked on rows + 1 zero halo row top/bottom
        # m_ref: (3*W*C, W*Cout)    bf16, fused depthwise*pointwise band matrix, K stacked over dh
        # b_ref: (1, W*Cout)        f32, fused bias tiled across W
        # o_ref: (1, BB*H, W*Cout)  f32, lane-dense output block
        xall = x_ref[0].astype(jnp.float32)          # one aligned full-tile load, upcast on VPU
        prev = xall[0:BBH, :]                        # row h-1 for output row h (dh = 0)
        cent = xall[1:BBH + 1, :]                    # row h                     (dh = 1)
        nxt = xall[2:BBH + 2, :]                     # row h+1                   (dh = 2)

        if BB > 1:
            # Zero the contributions that would leak across image boundaries inside the block.
            rid = lax.broadcasted_iota(jnp.int32, (BBH, WC), 0)
            prev = jnp.where(rid % H == 0, jnp.zeros_like(prev), prev)
            nxt = jnp.where(rid % H == H - 1, jnp.zeros_like(nxt), nxt)

        # Stack K over dh on the lane axis -> one big MXU matmul instead of three small ones.
        lhs = jnp.concatenate([prev, cent, nxt], axis=1).astype(jnp.bfloat16)  # (BB*H, 3*W*C)
        acc = jnp.dot(lhs, m_ref[...], preferred_element_type=jnp.float32)     # (BB*H, W*Cout)
        o_ref[0] = (acc + b_ref[...]).astype(o_ref.dtype)

    return kernel


def _fused_weights(w_dw, b_dw, w_pw, b_pw, W):
    """Build the fused (depthwise*pointwise) band matrix (bf16) and fused bias (f32)."""
    C = w_dw.shape[0]
    Cout = w_pw.shape[0]

    wdw = jnp.transpose(w_dw[:, 0, :, :], (1, 2, 0)).astype(jnp.float32)       # (3,3,C)
    wpw = jnp.transpose(w_pw[:, :, 0, 0], (1, 0)).astype(jnp.float32)          # (C,Cout)
    w_comb = wdw[:, :, :, None] * wpw[None, None, :, :]                        # (3,3,C,Cout)

    # Band selector S[dw, wi, wo] = 1 iff wi == wo + dw - 1 (folds the left/right zero pad).
    S = np.zeros((3, W, W), np.float32)
    for dw in range(3):
        for wo in range(W):
            wi = wo + dw - 1
            if 0 <= wi < W:
                S[dw, wi, wo] = 1.0

    # M[dh, wi*C + c, wo*Cout + co] = sum_dw S[dw,wi,wo] * w_comb[dh,dw,c,co]; stack K over dh.
    M = jnp.einsum('dio,hdcp->hicop', jnp.asarray(S), w_comb,
                   precision=lax.Precision.HIGHEST)
    M = M.reshape(3 * W * C, W * Cout).astype(jnp.bfloat16)

    b_comb = jnp.sum(b_dw.astype(jnp.float32)[:, None] * wpw, axis=0) \
        + b_pw.astype(jnp.float32)                                             # (Cout,)
    b_tiled = jnp.tile(b_comb, W).reshape(1, W * Cout)                         # (1, W*Cout) f32
    return M, b_tiled


def depth_sep_conv_block_nhwc(x_nhwc, w_dw, b_dw, w_pw, b_pw, *, max_rows_per_step=256):
    """Core: NHWC in -> NHWC out, lane-dense slabs end-to-end (no layout round trips)."""
    B, H, W, C = x_nhwc.shape
    Cout = w_pw.shape[0]
    WC, WCO = W * C, W * Cout

    # Batch-block: several images per grid step so the MXU M-dim is BB*H rows.
    BB = 1
    for cand in range(1, B + 1):
        if B % cand == 0 and cand * H <= max(max_rows_per_step, H):
            BB = cand
    NB = B // BB
    BBH = BB * H

    M, b_tiled = _fused_weights(w_dw, b_dw, w_pw, b_pw, W)

    # bf16 lane-dense slab with one shared zero halo row at the top/bottom of each batch
    # block; the pad + cast fuse into the relayout pass (no extra HBM round trip of x).
    x_slab = x_nhwc.reshape(NB, BBH, WC)
    x_slab = jnp.pad(x_slab, ((0, 0), (1, 1), (0, 0))).astype(jnp.bfloat16)    # (NB, BBH+2, WC)

    cost = pl.CostEstimate(
        flops=2 * NB * BBH * (3 * WC) * WCO,
        transcendentals=0,
        bytes_accessed=x_slab.size * 2 + M.size * 2 + b_tiled.size * 4 + NB * BBH * WCO * 4,
    )

    out = pl.pallas_call(
        _make_kernel(BB, H, WC, WCO),
        out_shape=jax.ShapeDtypeStruct((NB, BBH, WCO), jnp.float32),
        grid_spec=pltpu.PrefetchScalarGridSpec(
            num_scalar_prefetch=0,
            grid=(NB,),
            in_specs=[
                pl.BlockSpec((1, BBH + 2, WC), lambda b: (b, 0, 0)),   # padded activation block
                pl.BlockSpec((3 * WC, WCO), lambda b: (0, 0)),         # fused weights (resident)
                pl.BlockSpec((1, WCO), lambda b: (0, 0)),              # fused bias
            ],
            out_specs=pl.BlockSpec((1, BBH, WCO), lambda b: (b, 0, 0)),  # lane-dense output
        ),
        compiler_params=pltpu.CompilerParams(dimension_semantics=("parallel",)),
        cost_estimate=cost,
    )(x_slab, M, b_tiled)

    return out.reshape(B, H, W, Cout)


@jax.jit
def depth_sep_conv_block(x_nchw, w_dw, b_dw, w_pw, b_pw):
    """x_nchw: (B, C, H, W). w_dw: (C,1,3,3). b_dw: (C,). w_pw: (Cout,C,1,1). b_pw: (Cout,).

    NCHW wrapper kept only for the PyTorch module contract; the two transposes are the sole
    extra HBM passes. Callers holding NHWC should use depth_sep_conv_block_nhwc directly.
    """
    x_nhwc = jnp.transpose(x_nchw, (0, 2, 3, 1))
    out_nhwc = depth_sep_conv_block_nhwc(x_nhwc, w_dw, b_dw, w_pw, b_pw)
    return jnp.transpose(out_nhwc, (0, 3, 1, 2))


def _reference(x_nchw, w_dw, b_dw, w_pw, b_pw):
    """Pure-JAX reference (lax.conv, full f32 accuracy) for correctness check."""
    C = x_nchw.shape[1]
    y = lax.conv_general_dilated(
        x_nchw, w_dw, window_strides=(1, 1), padding=((1, 1), (1, 1)),
        dimension_numbers=("NCHW", "OIHW", "NCHW"), feature_group_count=C,
        precision=lax.Precision.HIGHEST)
    y = y + b_dw.reshape(1, -1, 1, 1)
    z = lax.conv_general_dilated(
        y, w_pw, window_strides=(1, 1), padding=((0, 0), (0, 0)),
        dimension_numbers=("NCHW", "OIHW", "NCHW"),
        precision=lax.Precision.HIGHEST)
    return z + b_pw.reshape(1, -1, 1, 1)


if __name__ == "__main__":
    B, C_in, C_out, H, W = 2, 4, 8, 16, 16
    key = jax.random.PRNGKey(0)
    kx, k1, k2, k3, k4 = jax.random.split(key, 5)

    x = jax.random.normal(kx, (B, C_in, H, W), dtype=jnp.float32)
    # deterministic parameter init (shapes match nn.Conv2d of the module)
    w_dw = jax.random.normal(k1, (C_in, 1, 3, 3), dtype=jnp.float32) * 0.1
    b_dw = jax.random.normal(k2, (C_in,), dtype=jnp.float32) * 0.1
    w_pw = jax.random.normal(k3, (C_out, C_in, 1, 1), dtype=jnp.float32) * 0.1
    b_pw = jax.random.normal(k4, (C_out,), dtype=jnp.float32) * 0.1

    out = jax.block_until_ready(depth_sep_conv_block(x, w_dw, b_dw, w_pw, b_pw))
    ref = jax.block_until_ready(_reference(x, w_dw, b_dw, w_pw, b_pw))

    assert out.shape == (B, C_out, H, W), out.shape
    # Tolerance covers bf16 operand transport on the MXU (~2^-9 relative per operand).
    err = float(jnp.max(jnp.abs(out - ref)))
    assert jnp.allclose(out, ref, atol=3e-3, rtol=3e-3), err

    print("KERNEL_OK")
</pallas_src>

<mosaic_0001>
module attributes {stable_mosaic.version = 11 : i64} {
  func.func @kernel(%arg0: i32, %arg1: memref<1x34x64xbf16, #tpu.memory_space<vmem>>, %arg2: memref<192x128xbf16, #tpu.memory_space<vmem>>, %arg3: memref<1x128xf32, #tpu.memory_space<vmem>>, %arg4: memref<1x32x128xf32, #tpu.memory_space<vmem>>) attributes {dimension_semantics = [#tpu.dimension_semantics<parallel>], iteration_bounds = array<i64: 1>, scalar_prefetch = 0 : i64, scratch_operands = 0 : i64, tpu.core_type = #tpu.core_type<tc>, window_params = [{transform_indices = @transform_0, window_bounds = array<i64: 1, 34, 64>}, {pipeline_mode = #tpu.pipeline_mode<synchronous>, transform_indices = @transform_1, window_bounds = array<i64: 192, 128>}, {pipeline_mode = #tpu.pipeline_mode<synchronous>, transform_indices = @transform_2, window_bounds = array<i64: 1, 128>}, {transform_indices = @transform_3, window_bounds = array<i64: 1, 32, 128>}]} {
    %c0 = arith.constant 0 : index
    %c0_0 = arith.constant 0 : index
    %c0_1 = arith.constant 0 : index
    %0 = vector.load %arg1[%c0, %c0_0, %c0_1] : memref<1x34x64xbf16, #tpu.memory_space<vmem>>, vector<1x34x64xbf16>
    %1 = vector.shape_cast %0 : vector<1x34x64xbf16> to vector<34x64xbf16>
    %2 = arith.extf %1 : vector<34x64xbf16> to vector<34x64xf32>
    %3 = vector.extract_strided_slice %2 {offsets = [0, 0], sizes = [32, 64], strides = [1, 1]} : vector<34x64xf32> to vector<32x64xf32>
    %4 = vector.extract_strided_slice %2 {offsets = [1, 0], sizes = [32, 64], strides = [1, 1]} : vector<34x64xf32> to vector<32x64xf32>
    %5 = vector.extract_strided_slice %2 {offsets = [2, 0], sizes = [32, 64], strides = [1, 1]} : vector<34x64xf32> to vector<32x64xf32>
    %6 = tpu.iota {dimensions = array<i32: 0>} : vector<32x64xi32>
    %c16_i32 = arith.constant 16 : i32
    %c0_i32 = arith.constant 0 : i32
    %7 = arith.cmpi eq, %c16_i32, %c0_i32 : i32
    %c1_i32 = arith.constant 1 : i32
    %8 = arith.select %7, %c1_i32, %c16_i32 : i32
    %9 = vector.broadcast %8 : i32 to vector<32x64xi32>
    %10 = arith.remsi %6, %9 : vector<32x64xi32>
    %c0_i32_2 = arith.constant 0 : i32
    %11 = vector.broadcast %c0_i32_2 : i32 to vector<32x64xi32>
    %12 = arith.cmpi ne, %10, %11 : vector<32x64xi32>
    %c0_i32_3 = arith.constant 0 : i32
    %13 = vector.broadcast %c0_i32_3 : i32 to vector<32x64xi32>
    %14 = arith.cmpi slt, %10, %13 : vector<32x64xi32>
    %c0_i32_4 = arith.constant 0 : i32
    %15 = arith.cmpi slt, %8, %c0_i32_4 : i32
    %16 = vector.broadcast %15 : i1 to vector<32x64xi1>
    %17 = vector.broadcast %16 : vector<32x64xi1> to vector<32x64xi1>
    %18 = arith.xori %14, %17 : vector<32x64xi1>
    %19 = arith.andi %18, %12 : vector<32x64xi1>
    %20 = vector.broadcast %8 : i32 to vector<32x64xi32>
    %21 = arith.addi %10, %20 : vector<32x64xi32>
    %22 = arith.select %19, %21, %10 : vector<32x64xi1>, vector<32x64xi32>
    %c0_i32_5 = arith.constant 0 : i32
    %23 = vector.broadcast %c0_i32_5 : i32 to vector<32x64xi32>
    %24 = arith.cmpi eq, %22, %23 : vector<32x64xi32>
    %cst = arith.constant 0.000000e+00 : f32
    %25 = vector.broadcast %cst : f32 to vector<32x64xf32>
    %26 = arith.select %24, %25, %3 : vector<32x64xi1>, vector<32x64xf32>
    %c16_i32_6 = arith.constant 16 : i32
    %c0_i32_7 = arith.constant 0 : i32
    %27 = arith.cmpi eq, %c16_i32_6, %c0_i32_7 : i32
    %c1_i32_8 = arith.constant 1 : i32
    %28 = arith.select %27, %c1_i32_8, %c16_i32_6 : i32
    %29 = vector.broadcast %28 : i32 to vector<32x64xi32>
    %30 = arith.remsi %6, %29 : vector<32x64xi32>
    %c0_i32_9 = arith.constant 0 : i32
    %31 = vector.broadcast %c0_i32_9 : i32 to vector<32x64xi32>
    %32 = arith.cmpi ne, %30, %31 : vector<32x64xi32>
    %c0_i32_10 = arith.constant 0 : i32
    %33 = vector.broadcast %c0_i32_10 : i32 to vector<32x64xi32>
    %34 = arith.cmpi slt, %30, %33 : vector<32x64xi32>
    %c0_i32_11 = arith.constant 0 : i32
    %35 = arith.cmpi slt, %28, %c0_i32_11 : i32
    %36 = vector.broadcast %35 : i1 to vector<32x64xi1>
    %37 = vector.broadcast %36 : vector<32x64xi1> to vector<32x64xi1>
    %38 = arith.xori %34, %37 : vector<32x64xi1>
    %39 = arith.andi %38, %32 : vector<32x64xi1>
    %40 = vector.broadcast %28 : i32 to vector<32x64xi32>
    %41 = arith.addi %30, %40 : vector<32x64xi32>
    %42 = arith.select %39, %41, %30 : vector<32x64xi1>, vector<32x64xi32>
    %c15_i32 = arith.constant 15 : i32
    %43 = vector.broadcast %c15_i32 : i32 to vector<32x64xi32>
    %44 = arith.cmpi eq, %42, %43 : vector<32x64xi32>
    %cst_12 = arith.constant 0.000000e+00 : f32
    %45 = vector.broadcast %cst_12 : f32 to vector<32x64xf32>
    %46 = arith.select %44, %45, %5 : vector<32x64xi1>, vector<32x64xf32>
    %47 = tpu.concatenate %26, %4, %46 in 1 : vector<32x64xf32>, vector<32x64xf32>, vector<32x64xf32> -> vector<32x192xf32>
    %48 = arith.truncf %47 : vector<32x192xf32> to vector<32x192xbf16>
    %c0_13 = arith.constant 0 : index
    %c0_14 = arith.constant 0 : index
    %49 = vector.load %arg2[%c0_13, %c0_14] : memref<192x128xbf16, #tpu.memory_space<vmem>>, vector<192x128xbf16>
    %cst_15 = arith.constant dense<0.000000e+00> : vector<32x128xf32>
    %50 = tpu.matmul %48, %49, %cst_15 {dimension_numbers = #tpu.dot_dimension_numbers<[1], [0], [0], [1], [0, 0, 1, 1], [], []>} : vector<32x192xbf16>, vector<192x128xbf16>, vector<32x128xf32> -> vector<32x128xf32>
    %c0_16 = arith.constant 0 : index
    %c0_17 = arith.constant 0 : index
    %51 = vector.load %arg3[%c0_16, %c0_17] : memref<1x128xf32, #tpu.memory_space<vmem>>, vector<1x128xf32>
    %52 = vector.broadcast %51 : vector<1x128xf32> to vector<32x128xf32>
    %53 = arith.addf %50, %52 : vector<32x128xf32>
    %c0_18 = arith.constant 0 : index
    %c0_19 = arith.constant 0 : index
    %c0_20 = arith.constant 0 : index
    %54 = vector.load %arg4[%c0_18, %c0_19, %c0_20] : memref<1x32x128xf32, #tpu.memory_space<vmem>>, vector<1x32x128xf32>
    %55 = vector.shape_cast %54 : vector<1x32x128xf32> to vector<32x128xf32>
    %56 = vector.shape_cast %53 : vector<32x128xf32> to vector<1x32x128xf32>
    tpu.vector_store %arg4[%c0_18, %c0_19, %c0_20], %56 {strides = array<i32>} : memref<1x32x128xf32, #tpu.memory_space<vmem>>, vector<1x32x128xf32>,
    return
  }
  func.func @transform_0(%arg0: i32) -> (i32, i32, i32) {
    %c0_i32 = arith.constant 0 : i32
    %c0_i32_0 = arith.constant 0 : i32
    %c0_i32_1 = arith.constant 0 : i32
    return %arg0, %c0_i32, %c0_i32_0 : i32, i32, i32
  }
  func.func @transform_1(%arg0: i32) -> (i32, i32) {
    %c0_i32 = arith.constant 0 : i32
    %c0_i32_0 = arith.constant 0 : i32
    %c0_i32_1 = arith.constant 0 : i32
    return %c0_i32, %c0_i32_0 : i32, i32
  }
  func.func @transform_2(%arg0: i32) -> (i32, i32) {
    %c0_i32 = arith.constant 0 : i32
    %c0_i32_0 = arith.constant 0 : i32
    %c0_i32_1 = arith.constant 0 : i32
    return %c0_i32, %c0_i32_0 : i32, i32
  }
  func.func @transform_3(%arg0: i32) -> (i32, i32, i32) {
    %c0_i32 = arith.constant 0 : i32
    %c0_i32_0 = arith.constant 0 : i32
    %c0_i32_1 = arith.constant 0 : i32
    return %arg0, %c0_i32, %c0_i32_0 : i32, i32, i32
  }
}

</mosaic_0001>

<bundles_post_ra>
// kernel: tile.8
= control target key start
LH: loop header
LB: loop body
LE: loop exit
PB: predicated region body
PF: predicated region fallthrough
CT: control target
= control target key end

     0   :  { %s28_s0 = inlined_call_operand.vmem [shape: f32[8], index: 0, kind: input, shape index: {}]   ;;  %s29_s1 = inlined_call_operand.vmem [shape: f32[16,8], index: 1, kind: output, shape index: {}]  }
   0x1   :  { %v4_v0 = vld [vmem:[%s28_s0] ss:$0 sm:$0xff] }
   0x2   :  { %5 = vst [vmem:[%s29_s1] sm:$0xff] %v4_v0  ;;  %8 = vst [vmem:[%s29_s1 + $0x8] sm:$0xff] %v4_v0 }

// kernel: tile.9
= control target key start
LH: loop header
LB: loop body
LE: loop exit
PB: predicated region body
PF: predicated region fallthrough
CT: control target
= control target key end

     0   :  { %s131_s10 = smov 120   ;;  %s132_s11 = smov 104   ;;  %vm3_vm0 = vcmask 64512   ;;  %vm9_vm1 = vcmask 1048512   ;;  %vm15_vm2 = vcmask 982912   ;;  %vm21_vm3 = vcmask 917312   ;;  %s207_s0 = inlined_call_operand.vmem [shape: f32[16,8], index: 0, kind: input, shape index: {}]   ;;  %s208_s1 = inlined_call_operand.vmem [shape: f32[1,128], index: 1, kind: output, shape index: {}]  }
   0x1   :  { %v101_v0 = vld [vmem:[%s207_s0 + $0xf] sm:$0x1]   ;;  %v103_v1 = vld [vmem:[%s207_s0 + $0xd] sm:$0x1]   ;;  %v102_v2 = vld [vmem:[%s207_s0 + $0xe] sm:$0x1]  }
   0x2   :  { %7 = vrot.lane.b32.xlu0 %v101_v0, %s131_s10  ;;  %19 = vrot.lane.b32.xlu1 %v103_v1, %s132_s11  ;;  %v104_v3 = vld [vmem:[%s207_s0 + $0xc] sm:$0x1]   ;;  %s133_s16 = smov 112   ;;  %s134_s17 = smov 96   ;;  %v105_v4 = vld [vmem:[%s207_s0 + $0xb] sm:$0x1]  }
   0x3   :  { %v106_v5 = vld [vmem:[%s207_s0 + $0xa] sm:$0x1]   ;;  %v2_v6 = vld [vmem:[%s207_s0] sm:$0x1]   ;;  %s135_s24 = smov 88   ;;  %s136_s25 = smov 80  }
   0x4   :  { %4 = vst.msk [vmem:[#allocation0] sm:$0x1] %vm3_vm0, %v2_v6   ;;  %v107_v7 = vld [vmem:[%s207_s0 + $0x9] sm:$0x1]   ;;  %v108_v8 = vld [vmem:[%s207_s0 + $0x8] sm:$0x1]  }
   0x5   :  { %s137_s30 = smov 72   ;;  %s138_s2 = smov 64   ;;  %v109_v9 = vld [vmem:[%s207_s0 + $0x7] sm:$0x1]   ;;  %v110_v10 = vld [vmem:[%s207_s0 + $0x6] sm:$0x1]  }
   0x6   :  { %13 = vrot.lane.b32.xlu0 %v102_v2, %s133_s16  ;;  %25 = vrot.lane.b32.xlu1 %v104_v3, %s134_s17  ;;  %s139_s7 = smov 56   ;;  %s140_s8 = smov 48   ;;  %v111_v11 = vld [vmem:[%s207_s0 + $0x5] sm:$0x1]   ;;  %v112_v12 = vld [vmem:[%s207_s0 + $0x4] sm:$0x1]  }
   0x7   :  { %s141_s13 = smov 40   ;;  %s142_s14 = smov 32   ;;  %v113_v13 = vld [vmem:[%s207_s0 + $0x3] sm:$0x1]   ;;  %v114_v14 = vld [vmem:[%s207_s0 + $0x2] sm:$0x1]  }
   0x8   :  { %s143_s19 = smov 24   ;;  %s144_s20 = smov 16   ;;  %v115_v15 = vld [vmem:[%s207_s0 + $0x1] sm:$0x1]   ;;  %vm27_vm4 = vcmask 851712   ;;  %vm33_vm5 = vcmask 786112  }
   0x9   :  { %s145_s0 = smov 8   ;;  %vm39_vm6 = vcmask 720512   ;;  %vm45_vm7 = vcmask 654912   ;;  %vm51_vm8 = vcmask 589312   ;;  %vm57_vm9 = vcmask 523712  }
   0xa   :  { %31 = vrot.lane.b32.xlu0 %v105_v4, %s135_s24  ;;  %37 = vrot.lane.b32.xlu1 %v106_v5, %s136_s25  ;;  %vm63_vm10 = vcmask 458112   ;;  %vm69_vm11 = vcmask 392512   ;;  %vm75_vm12 = vcmask 326912   ;;  %vm81_vm13 = vcmask 261312  }
   0xb   :  { %vm87_vm14 = vcmask 195712   ;;  %vm93_vm15 = vcmask 130112  }
   0xe   :  { %43 = vrot.lane.b32.xlu0 %v107_v7, %s137_s30  ;;  %49 = vrot.lane.b32.xlu1 %v108_v8, %s138_s2 }
  0x12   :  { %55 = vrot.lane.b32.xlu0 %v109_v9, %s139_s7  ;;  %61 = vrot.lane.b32.xlu1 %v110_v10, %s140_s8 }
  0x16   :  { %67 = vrot.lane.b32.xlu0 %v111_v11, %s141_s13  ;;  %73 = vrot.lane.b32.xlu1 %v112_v12, %s142_s14 }
  0x1a   :  { %79 = vrot.lane.b32.xlu0 %v113_v13, %s143_s19  ;;  %85 = vrot.lane.b32.xlu1 %v114_v14, %s144_s20 }
  0x1e   :  { %91 = vrot.lane.b32.xlu0 %v115_v15, %s145_s0 }
  0x74   :  { %v8_v16 = vpop.permute.xlu0 %7   ;;  %v20_v17 = vpop.permute.xlu1 %19  }
  0x75   :  { %10 = vst.msk [vmem:[#allocation0] sm:$0x1] %vm9_vm1, %v8_v16  }
  0x78   :  { %v14_v18 = vpop.permute.xlu0 %13   ;;  %v26_v19 = vpop.permute.xlu1 %25  }
  0x79   :  { %16 = vst.msk [vmem:[#allocation0] sm:$0x1] %vm15_vm2, %v14_v18  }
  0x7a   :  { %22 = vst.msk [vmem:[#allocation0] sm:$0x1] %vm21_vm3, %v20_v17  }
  0x7b   :  { %28 = vst.msk [vmem:[#allocation0] sm:$0x1] %vm27_vm4, %v26_v19  }
  0x7c   :  { %v32_v20 = vpop.permute.xlu0 %31   ;;  %v38_v21 = vpop.permute.xlu1 %37  }
  0x7d   :  { %34 = vst.msk [vmem:[#allocation0] sm:$0x1] %vm33_vm5, %v32_v20  }
  0x7e   :  { %40 = vst.msk [vmem:[#allocation0] sm:$0x1] %vm39_vm6, %v38_v21  }
  0x80   :  { %v44_v22 = vpop.permute.xlu0 %43   ;;  %v50_v23 = vpop.permute.xlu1 %49  }
  0x81   :  { %46 = vst.msk [vmem:[#allocation0] sm:$0x1] %vm45_vm7, %v44_v22  }
  0x82   :  { %52 = vst.msk [vmem:[#allocation0] sm:$0x1] %vm51_vm8, %v50_v23  }
  0x84   :  { %v56_v24 = vpop.permute.xlu0 %55   ;;  %v62_v25 = vpop.permute.xlu1 %61  }
  0x85   :  { %58 = vst.msk [vmem:[#allocation0] sm:$0x1] %vm57_vm9, %v56_v24  }
  0x86   :  { %64 = vst.msk [vmem:[#allocation0] sm:$0x1] %vm63_vm10, %v62_v25  }
  0x88   :  { %v68_v26 = vpop.permute.xlu0 %67   ;;  %v74_v27 = vpop.permute.xlu1 %73  }
  0x89   :  { %70 = vst.msk [vmem:[#allocation0] sm:$0x1] %vm69_vm11, %v68_v26  }
  0x8a   :  { %76 = vst.msk [vmem:[#allocation0] sm:$0x1] %vm75_vm12, %v74_v27  }
  0x8c   :  { %v80_v28 = vpop.permute.xlu0 %79   ;;  %v86_v29 = vpop.permute.xlu1 %85  }
  0x8d   :  { %82 = vst.msk [vmem:[#allocation0] sm:$0x1] %vm81_vm13, %v80_v28  }
  0x8e   :  { %88 = vst.msk [vmem:[#allocation0] sm:$0x1] %vm87_vm14, %v86_v29  }
  0x90   :  { %v92_v30 = vpop.permute.xlu0 %91  }
  0x91   :  { %94 = vst.msk [vmem:[#allocation0] sm:$0x1] %vm93_vm15, %v92_v30  }
  0x98   :  { %v98_v31 = vld [vmem:[#allocation0] sm:$0x1] }
  0x99   :  { %100 = vst [vmem:[%s208_s1] sm:$0x1] %v98_v31 }

// kernel: depth_sep_conv_block.1
= control target key start
LH: loop header
LB: loop body
LE: loop exit
PB: predicated region body
PF: predicated region fallthrough
CT: control target
= control target key end

     0   :  { %v25_v0 = vlaneseq  ;;  %vm113_vm0 = vcmask 1046528   ;;  %v382_v4 = vmov 0   ;;  %s383_s23 = smov 64   ;;  %vm95_vm1 = vcmask 1045504   ;;  %s534_s0 = inlined_call_operand.vmem [shape: bf16[1,34,64], index: 0, kind: input, shape index: {}]   ;;  %s535_s1 = inlined_call_operand.vmem [shape: bf16[192,128], index: 1, kind: input, shape index: {}]   ;;  %s536_s2 = inlined_call_operand.vmem [shape: f32[1,128], index: 2, kind: input, shape index: {}]   ;;  %s537_s3 = inlined_call_operand.vmem [shape: f32[1,32,128], index: 3, kind: output, shape index: {}]  }
   0x1   :  { %v326_v1 = vld [vmem:[%s534_s0] sm:$0xff]   ;;  %v333_v2 = vld [vmem:[%s534_s0 + $0x8] sm:$0xff]   ;;  %v19_v3 = vld [vmem:[%s534_s0 + $0x10] sm:$0x1]  ;;  %253 = vmatprep.subr.bf16.mxu0 %v382_v4  ;;  %334 = vmatprep.subr.bf16.mxu1 %v382_v4  ;;  %vm135_vm4 = vcmask 523264  }
   0x2   :  { %v415_v5 = vunpack.c.l.bf16 %v326_v1  ;;  %v417_v6 = vunpack.c.h.bf16 %v326_v1  ;;  %v419_v7 = vunpack.c.l.bf16 %v333_v2  ;;  %v421_v8 = vunpack.c.h.bf16 %v333_v2  ;;  %v370_v9 = vld [vmem:[%s535_s1] sm:$0xff]   ;;  %v371_v11 = vld [vmem:[%s535_s1 + $0x8] sm:$0xff]   ;;  %v372_v24 = vld [vmem:[%s535_s1 + $0x10] sm:$0xff]  }
   0x3   :  { %v24_v10 = vunpack.c.l.bf16 %v19_v3  ;;  %v26_v12 = vshrl.u32 %v25_v0, 7  ;;  %254 = vmatpush1.bf16.msra.mxu0 %v370_v9  ;;  %346 = vmatpush1.bf16.msra.mxu1 %v370_v9  ;;  %v373_v30 = vld [vmem:[%s535_s1 + $0x18] sm:$0xff]   ;;  %v374_v42 = vld [vmem:[%s535_s1 + $0x20] sm:$0xff]   ;;  %v375_v49 = vld [vmem:[%s535_s1 + $0x28] sm:$0xff]  }
   0x4   :  { %v114_v13 = vrot.slane %v415_v5, 1  ;;  %v115_v14 = vrot.slane %v417_v6, 1  ;;  %v117_v15 = vrot.slane %v419_v7, 1  ;;  %v119_v16 = vrot.slane %v421_v8, 1  ;;  %255 = vmatprep.subr.bf16.mxu0 %v382_v4  ;;  %335 = vmatprep.subr.bf16.mxu1 %v382_v4  ;;  %v376_v52 = vld [vmem:[%s535_s1 + $0x30] sm:$0xff]   ;;  %v377_v53 = vld [vmem:[%s535_s1 + $0x38] sm:$0xff]  }
   0x5   :  { %v121_v17 = vrot.slane %v24_v10, 1  ;;  %v27_v21 = vadd.s32 8, %v26_v12  ;;  %v96_v26 = vrot.slane %v415_v5, 2  ;;  %v97_v28 = vrot.slane %v417_v6, 2  ;;  %v378_v54 = vld [vmem:[%s535_s1 + $0x40] sm:$0xff]   ;;  %v379_v55 = vld [vmem:[%s535_s1 + $0x48] sm:$0xff]  }
   0x6   :  { %v116_v18 = vsel %vm113_vm0, %v114_v13, %v115_v14  ;;  %v118_v19 = vsel %vm113_vm0, %v115_v14, %v117_v15  ;;  %v120_v20 = vsel %vm113_vm0, %v117_v15, %v119_v16  ;;  %v99_v29 = vrot.slane %v419_v7, 2  ;;  %v380_v56 = vld [vmem:[%s535_s1 + $0x50] sm:$0xff]   ;;  %v381_v57 = vld [vmem:[%s535_s1 + $0x58] sm:$0xff]  }
   0x7   :  { %v360_v22 = vpack.i.bf16 %v118_v19, %v116_v18  ;;  %v122_v23 = vsel %vm113_vm0, %v119_v16, %v121_v17  ;;  %256 = vmatpush1.bf16.msra.mxu0 %v371_v11  ;;  %347 = vmatpush1.bf16.msra.mxu1 %v371_v11  ;;  %v41_v25 = vand.u32 15, %v27_v21  ;;  %v98_v31 = vsel %vm95_vm1, %v96_v26, %v97_v28 }
   0x8   :  { %v365_v27 = vpack.i.bf16 %v122_v23, %v120_v20  ;;  %257 = vmatprep.subr.bf16.mxu0 %v382_v4  ;;  %336 = vmatprep.subr.bf16.mxu1 %v382_v4  ;;  %v34_v32 = vand.u32 15, %v26_v12  ;;  %v100_v33 = vsel %vm95_vm1, %v97_v28, %v99_v29  ;;  %v29_v34 = vadd.s32 24, %v26_v12 }
   0x9   :  { %361 = vrot.lane.b32.xlu0 %v360_v22, %s383_s23  ;;  %vm87_vm2 = vcmp.eq.s32.totalorder %v41_v25, 15  ;;  %v101_v37 = vrot.slane %v421_v8, 2  ;;  %v103_v41 = vrot.slane %v24_v10, 2  ;;  %v28_v44 = vadd.s32 16, %v26_v12 }
   0xa   :  { %v110_v35 = vsel %vm87_vm2, 0.0, %v100_v33  ;;  %vm454_vm3 = vcmp.eq.s32.totalorder %v34_v32, 0  ;;  %v55_v40 = vand.u32 15, %v29_v34 }
   0xb   :  { %258 = vmatpush1.bf16.msra.mxu0 %v372_v24  ;;  %348 = vmatpush1.bf16.msra.mxu1 %v372_v24  ;;  %v141_v38 = vpack.c.bf16 %v110_v35, %v98_v31  ;;  %v82_v39 = vsel %vm454_vm3, 0.0, %v415_v5  ;;  %v102_v43 = vsel %vm95_vm1, %v99_v29, %v101_v37  ;;  %v104_v45 = vsel %vm95_vm1, %v101_v37, %v103_v41 }
   0xc   :  { %259 = vmatprep.subr.bf16.mxu0 %v382_v4  ;;  %337 = vmatprep.subr.bf16.mxu1 %v382_v4  ;;  %vm89_vm5 = vcmp.eq.s32.totalorder %v55_v40, 15  ;;  %v48_v47 = vand.u32 15, %v28_v44 }
   0xd   :  { %366 = vrot.lane.b32.xlu0 %v365_v27, %s383_s23  ;;  %323 = vmatprep.mubr.msk.bf16.mxu0 %vm135_vm4, %v141_v38  ;;  %v112_v46 = vsel %vm89_vm5, 0.0, %v104_v45 }
   0xe   :  { %v143_v48 = vpack.c.bf16 %v112_v46, %v102_v43  ;;  %vm473_vm6 = vcmp.eq.s32.totalorder %v48_v47, 0 }
   0xf   :  { %260 = vmatpush1.bf16.msra.mxu0 %v373_v30  ;;  %349 = vmatpush1.bf16.msra.mxu1 %v373_v30  ;;  %v84_v51 = vsel %vm473_vm6, 0.0, %v419_v7  ;;  %v310_v7 = vld [vmem:[%s536_s2] ss:$0 sm:$0xff] }
  0x10   :  { %261 = vmatprep.subr.bf16.mxu0 %v382_v4  ;;  %338 = vmatprep.subr.bf16.mxu1 %v382_v4 }
  0x11   :  { %324 = vmatprep.mubr.msk.bf16.mxu1 %vm135_vm4, %v143_v48 }
  0x13   :  { %262 = vmatpush1.bf16.msra.mxu0 %v374_v42  ;;  %350 = vmatpush1.bf16.msra.mxu1 %v374_v42 }
  0x14   :  { %263 = vmatprep.subr.bf16.mxu0 %v382_v4  ;;  %339 = vmatprep.subr.bf16.mxu1 %v382_v4 }
  0x17   :  { %264 = vmatpush1.bf16.msra.mxu0 %v375_v49  ;;  %351 = vmatpush1.bf16.msra.mxu1 %v375_v49 }
  0x18   :  { %265 = vmatprep.subr.bf16.mxu0 %v382_v4  ;;  %340 = vmatprep.subr.bf16.mxu1 %v382_v4 }
  0x1b   :  { %266 = vmatpush1.bf16.msra.mxu0 %v376_v52  ;;  %352 = vmatpush1.bf16.msra.mxu1 %v376_v52 }
  0x1c   :  { %267 = vmatprep.subr.bf16.mxu0 %v382_v4  ;;  %341 = vmatprep.subr.bf16.mxu1 %v382_v4 }
  0x1f   :  { %268 = vmatpush1.bf16.msra.mxu0 %v377_v53  ;;  %353 = vmatpush1.bf16.msra.mxu1 %v377_v53 }
  0x20   :  { %269 = vmatprep.subr.bf16.mxu0 %v382_v4  ;;  %342 = vmatprep.subr.bf16.mxu1 %v382_v4 }
  0x23   :  { %270 = vmatpush1.bf16.msra.mxu0 %v378_v54  ;;  %354 = vmatpush1.bf16.msra.mxu1 %v378_v54 }
  0x24   :  { %271 = vmatprep.subr.bf16.mxu0 %v382_v4  ;;  %343 = vmatprep.subr.bf16.mxu1 %v382_v4 }
  0x27   :  { %272 = vmatpush1.bf16.msra.mxu0 %v379_v55  ;;  %355 = vmatpush1.bf16.msra.mxu1 %v379_v55 }
  0x28   :  { %273 = vmatprep.subr.bf16.mxu0 %v382_v4  ;;  %344 = vmatprep.subr.bf16.mxu1 %v382_v4 }
  0x2b   :  { %274 = vmatpush1.bf16.msra.mxu0 %v380_v56  ;;  %356 = vmatpush1.bf16.msra.mxu1 %v380_v56 }
  0x2c   :  { %275 = vmatprep.subr.bf16.mxu0 %v382_v4  ;;  %345 = vmatprep.subr.bf16.mxu1 %v382_v4 }
  0x2f   :  { %276 = vmatpush1.bf16.msra.mxu0 %v381_v57  ;;  %357 = vmatpush1.bf16.msra.mxu1 %v381_v57 }
  0x7b   :  { %v362_v58 = vpop.permute.xlu0 %361 }
  0x7c   :  { %v364_v59 = vunpack.i.h.bf16 %v362_v58  ;;  %v363_v60 = vunpack.i.l.bf16 %v362_v58 }
  0x7e   :  { %v136_v61 = vsel %vm135_vm4, %v82_v39, %v363_v60  ;;  %v137_v62 = vsel %vm135_vm4, %v417_v6, %v364_v59 }
  0x7f   :  { %v367_v63 = vpop.permute.xlu0 %366  ;;  %v140_v0 = vpack.c.bf16 %v137_v62, %v136_v61 }
  0x80   :  { %v369_v1 = vunpack.i.h.bf16 %v367_v63  ;;  %v368_v2 = vunpack.i.l.bf16 %v367_v63 }
  0x81   :  { %286 = vmatmul.mubr.bf16.vlgmr.msra.gmra.mrb[0].mxu0 %v140_v0 }
  0x82   :  { %v138_v3 = vsel %vm135_vm4, %v84_v51, %v368_v2  ;;  %v139_v4 = vsel %vm135_vm4, %v421_v8, %v369_v1 }
  0x83   :  { %v142_v5 = vpack.c.bf16 %v139_v4, %v138_v3 }
  0x85   :  { %294 = vmatmul.mubr.bf16.vlgmr.msra.gmra.mrb[0].mxu1 %v142_v5 }
 0x154   :  { %v287_v9 = vpop.f32.mrb[0].mxu0 }
 0x155   :  { %v288_v10 = vadd.f32 %v310_v7, %v287_v9  ;;  %v289_v11 = vpop.f32.mrb[1].mxu0 }
 0x156   :  { %v290_v6 = vpop.f32.mrb[2].mxu0 }
 0x157   :  { %302 = vst [vmem:[%s537_s3] sm:$0xff] %v288_v10  ;;  %v291_v12 = vadd.f32 %v310_v7, %v290_v6  ;;  %v292_v13 = vpop.f32.mrb[3].mxu0 }
 0x158   :  { %v295_v14 = vpop.f32.mrb[0].mxu1 }
 0x159   :  { %303 = vst [vmem:[%s537_s3 + $0x8] sm:$0xff] %v291_v12  ;;  %v296_v8 = vadd.f32 %v310_v7, %v295_v14  ;;  %v297_v15 = vpop.f32.mrb[1].mxu1 }
 0x15a   :  { %v298_v16 = vpop.f32.mrb[2].mxu1 }
 0x15b   :  { %304 = vst [vmem:[%s537_s3 + $0x10] sm:$0xff] %v296_v8  ;;  %v299_v17 = vadd.f32 %v310_v7, %v298_v16  ;;  %v300_v18 = vpop.f32.mrb[3].mxu1 }
 0x15d   :  { %305 = vst [vmem:[%s537_s3 + $0x18] sm:$0xff] %v299_v17 }

</bundles_post_ra>
